<compile_context>
chip_gen: v7x
topology: tpu7x:2x2x1
jax: 0.10.0
libtpu: 0.0.40
codegen_flags: <defaults>
</compile_context>

<pallas_src>
import math
import jax
import jax.numpy as jnp
import numpy as np
from jax.experimental import pallas as pl
from jax.experimental.pallas import tpu as pltpu

EPS = 1e-5  # LayerNorm eps for fp32 inputs


def _default_batch_block(batch):
    """Fold the whole batch on single-TC chips (v5e/v6e); keep one batch per
    grid step on multi-TC chips (v7x, v4/v5p) so the parallel axis shards."""
    try:
        kind = jax.devices()[0].device_kind.lower()
    except Exception:
        kind = ""
    single_tc = any(s in kind for s in ("lite", "v5e", "v6e"))
    return batch if single_tc else 1


def cross_attention_pallas(x, ctx, params, *, heads, dim_head, batch_block=None):
    B, N, dim = x.shape
    _, M, cdim = ctx.shape
    inner = heads * dim_head
    scale_sqrt = math.sqrt(dim_head ** -0.5)   # q and k each scaled by sqrt(scale)

    if batch_block is None:
        batch_block = _default_batch_block(B)
    bb = batch_block
    assert B % bb == 0, "batch_block must divide batch"

    # ---- host-side parameter prep (one-time cost in a real model) ----------
    # Fold sqrt(scale) into the Q projection, the K half of the fused KV
    # projection, and the null key.  Tile the null k/v (shared across heads)
    # into the fused (1, 2*inner) lane layout.
    wq = params["wq"] * scale_sqrt                                              # (dim, inner)
    wkv = jnp.concatenate([params["wk"] * scale_sqrt, params["wv"]], axis=1)    # (cdim, 2*inner)
    nkv = jnp.concatenate([jnp.tile(params["null_k"] * scale_sqrt, (1, heads)),
                           jnp.tile(params["null_v"], (1, heads))], axis=1)     # (1, 2*inner)

    def kernel(x_ref, ctx_ref, wq_ref, wkv_ref, wo_ref,
               g_in_ref, g_out_ref, nkv_ref, o_ref):
        # Flatten (bb, seq, feat) blocks to 2-D so each projection is a single
        # wide MXU matmul (better sublane fill when bb > 1).
        x2 = x_ref[...].reshape(bb * N, dim)        # (bb*N, dim)
        c2 = ctx_ref[...].reshape(bb * M, cdim)     # (bb*M, cdim)

        # ---- input LayerNorm (unbiased=False variance, gain only) ----
        mean = jnp.mean(x2, axis=-1, keepdims=True)
        xc = x2 - mean
        var = jnp.mean(xc * xc, axis=-1, keepdims=True)
        xn = xc * jax.lax.rsqrt(var + EPS) * g_in_ref[...]

        # ---- projections (scale already folded into weights) ----
        q2 = jnp.dot(xn, wq_ref[...], preferred_element_type=jnp.float32)    # (bb*N, inner)
        kv2 = jnp.dot(c2, wkv_ref[...], preferred_element_type=jnp.float32)  # (bb*M, 2*inner)

        # ---- prepend the null kv token once along the key axis ----
        kv3 = kv2.reshape(bb, M, 2 * inner)
        null_row = jnp.broadcast_to(nkv_ref[...].reshape(1, 1, 2 * inner),
                                    (bb, 1, 2 * inner))
        kvf = jnp.concatenate([null_row, kv3], axis=1)                        # (bb, M+1, 2*inner)

        q3 = q2.reshape(bb, N, inner)

        # ---- per-head attention as batched contractions ----
        head_outs = []
        for h in range(heads):
            lo = h * dim_head
            qh = q3[:, :, lo:lo + dim_head]                       # (bb, N, d)
            kh = kvf[:, :, lo:lo + dim_head]                      # (bb, M+1, d)
            vh = kvf[:, :, inner + lo:inner + lo + dim_head]      # (bb, M+1, d)

            sim = jnp.einsum('bnd,bmd->bnm', qh, kh,
                             preferred_element_type=jnp.float32)  # (bb, N, M+1)
            mx = jnp.max(sim, axis=-1, keepdims=True)
            p = jnp.exp(sim - mx)
            inv = pl.reciprocal(jnp.sum(p, axis=-1, keepdims=True), approx=False)
            oh = jnp.einsum('bnm,bmd->bnd', p, vh,
                            preferred_element_type=jnp.float32) * inv
            head_outs.append(oh.reshape(bb * N, dim_head))

        # single output projection on the concatenated head outputs
        out_inner = jnp.concatenate(head_outs, axis=-1)            # (bb*N, inner)
        o_pre = jnp.dot(out_inner, wo_ref[...],
                        preferred_element_type=jnp.float32)        # (bb*N, dim)

        # ---- output LayerNorm ----
        om = jnp.mean(o_pre, axis=-1, keepdims=True)
        oc = o_pre - om
        ov = jnp.mean(oc * oc, axis=-1, keepdims=True)
        o2 = oc * jax.lax.rsqrt(ov + EPS) * g_out_ref[...]
        o_ref[...] = o2.reshape(bb, N, dim).astype(o_ref.dtype)

    full2d = lambda shape: pl.BlockSpec(shape, lambda b: (0, 0))
    return pl.pallas_call(
        kernel,
        out_shape=jax.ShapeDtypeStruct((B, N, dim), x.dtype),
        grid=(B // bb,),
        in_specs=[
            pl.BlockSpec((bb, N, dim), lambda b: (b, 0, 0)),    # x
            pl.BlockSpec((bb, M, cdim), lambda b: (b, 0, 0)),   # context
            full2d((dim, inner)),        # wq  (scale folded)
            full2d((cdim, 2 * inner)),   # wkv (fused; scale folded into K half)
            full2d((inner, dim)),        # wo
            full2d((1, dim)),            # g_in
            full2d((1, dim)),            # g_out
            full2d((1, 2 * inner)),      # null kv row (scale folded into K half)
        ],
        out_specs=pl.BlockSpec((bb, N, dim), lambda b: (b, 0, 0)),
        compiler_params=pltpu.CompilerParams(dimension_semantics=("parallel",)),
    )(x, ctx, wq, wkv, params["wo"], params["g_in"], params["g_out"], nkv)


def reference(x, ctx, params, *, heads, dim_head):
    def ln(t, g):
        mean = jnp.mean(t, -1, keepdims=True)
        var = jnp.mean((t - mean) ** 2, -1, keepdims=True)
        return (t - mean) * jax.lax.rsqrt(var + EPS) * g

    b, n, dim = x.shape
    xn = ln(x, params["g_in"][0])
    q = xn @ params["wq"]
    k = ctx @ params["wk"]
    v = ctx @ params["wv"]

    def split_heads(t):
        b_, s, _ = t.shape
        return t.reshape(b_, s, heads, dim_head).transpose(0, 2, 1, 3)

    q, k, v = map(split_heads, (q, k, v))
    nk = jnp.broadcast_to(params["null_k"][0], (b, heads, 1, dim_head))
    nv = jnp.broadcast_to(params["null_v"][0], (b, heads, 1, dim_head))
    k = jnp.concatenate([nk, k], axis=2)
    v = jnp.concatenate([nv, v], axis=2)
    s = math.sqrt(dim_head ** -0.5)
    sim = jnp.einsum("bhid,bhjd->bhij", q * s, k * s)
    attn = jax.nn.softmax(sim.astype(jnp.float32), axis=-1).astype(sim.dtype)
    out = jnp.einsum("bhij,bhjd->bhid", attn, v)
    out = out.transpose(0, 2, 1, 3).reshape(b, n, heads * dim_head)
    return ln(out @ params["wo"], params["g_out"][0])


if __name__ == "__main__":
    # TODO(synk): optional `mask` argument path (key-padding mask) not implemented (mask=None).
    B, N, M = 2, 16, 8
    dim, heads, dim_head = 32, 4, 16
    cdim = dim                      # context_dim defaults to dim
    inner = heads * dim_head

    key = jax.random.PRNGKey(0)
    ks = jax.random.split(key, 8)
    x = jax.random.normal(ks[0], (B, N, dim), jnp.float32)
    ctx = jax.random.normal(ks[1], (B, M, cdim), jnp.float32)

    params = {
        "wq": jax.random.normal(ks[2], (dim, inner), jnp.float32) * 0.05,
        "wk": jax.random.normal(ks[3], (cdim, inner), jnp.float32) * 0.05,
        "wv": jax.random.normal(ks[4], (cdim, inner), jnp.float32) * 0.05,
        "wo": jax.random.normal(ks[5], (inner, dim), jnp.float32) * 0.05,
        "g_in": jnp.ones((1, dim), jnp.float32),    # LayerNorm gains init to 1
        "g_out": jnp.ones((1, dim), jnp.float32),
        "null_k": jax.random.normal(ks[6], (1, dim_head), jnp.float32),
        "null_v": jax.random.normal(ks[7], (1, dim_head), jnp.float32),
    }

    out = cross_attention_pallas(x, ctx, params, heads=heads, dim_head=dim_head)
    out = jax.block_until_ready(out)

    ref = reference(x, ctx, params, heads=heads, dim_head=dim_head)
    np.testing.assert_allclose(np.asarray(out), np.asarray(ref), rtol=2e-5, atol=2e-5)
    print("KERNEL_OK")
</pallas_src>

<mosaic_0001>
module attributes {stable_mosaic.version = 11 : i64} {
  func.func @kernel(%arg0: i32, %arg1: memref<1x16x32xf32, #tpu.memory_space<vmem>>, %arg2: memref<1x8x32xf32, #tpu.memory_space<vmem>>, %arg3: memref<32x64xf32, #tpu.memory_space<vmem>>, %arg4: memref<32x128xf32, #tpu.memory_space<vmem>>, %arg5: memref<64x32xf32, #tpu.memory_space<vmem>>, %arg6: memref<1x32xf32, #tpu.memory_space<vmem>>, %arg7: memref<1x32xf32, #tpu.memory_space<vmem>>, %arg8: memref<1x128xf32, #tpu.memory_space<vmem>>, %arg9: memref<1x16x32xf32, #tpu.memory_space<vmem>>) attributes {dimension_semantics = [#tpu.dimension_semantics<parallel>], iteration_bounds = array<i64: 2>, scalar_prefetch = 0 : i64, scratch_operands = 0 : i64, tpu.core_type = #tpu.core_type<tc>, window_params = [{transform_indices = @transform_0, window_bounds = array<i64: 1, 16, 32>}, {transform_indices = @transform_1, window_bounds = array<i64: 1, 8, 32>}, {pipeline_mode = #tpu.pipeline_mode<synchronous>, transform_indices = @transform_2, window_bounds = array<i64: 32, 64>}, {pipeline_mode = #tpu.pipeline_mode<synchronous>, transform_indices = @transform_3, window_bounds = array<i64: 32, 128>}, {pipeline_mode = #tpu.pipeline_mode<synchronous>, transform_indices = @transform_4, window_bounds = array<i64: 64, 32>}, {pipeline_mode = #tpu.pipeline_mode<synchronous>, transform_indices = @transform_5, window_bounds = array<i64: 1, 32>}, {pipeline_mode = #tpu.pipeline_mode<synchronous>, transform_indices = @transform_6, window_bounds = array<i64: 1, 32>}, {pipeline_mode = #tpu.pipeline_mode<synchronous>, transform_indices = @transform_7, window_bounds = array<i64: 1, 128>}, {transform_indices = @transform_8, window_bounds = array<i64: 1, 16, 32>}]} {
    %c0 = arith.constant 0 : index
    %c0_0 = arith.constant 0 : index
    %c0_1 = arith.constant 0 : index
    %0 = vector.load %arg1[%c0, %c0_0, %c0_1] : memref<1x16x32xf32, #tpu.memory_space<vmem>>, vector<1x16x32xf32>
    %1 = vector.shape_cast %0 : vector<1x16x32xf32> to vector<16x32xf32>
    %c0_2 = arith.constant 0 : index
    %c0_3 = arith.constant 0 : index
    %c0_4 = arith.constant 0 : index
    %2 = vector.load %arg2[%c0_2, %c0_3, %c0_4] : memref<1x8x32xf32, #tpu.memory_space<vmem>>, vector<1x8x32xf32>
    %3 = vector.shape_cast %2 : vector<1x8x32xf32> to vector<8x32xf32>
    %cst = arith.constant dense<0.000000e+00> : vector<16xf32>
    %4 = vector.multi_reduction <add>, %1, %cst [1] : vector<16x32xf32> to vector<16xf32>
    %5 = vector.shape_cast %4 : vector<16xf32> to vector<16x1xf32>
    %cst_5 = arith.constant 3.200000e+01 : f32
    %6 = vector.broadcast %cst_5 : f32 to vector<16x1xf32>
    %7 = arith.divf %5, %6 : vector<16x1xf32>
    %8 = vector.broadcast %7 : vector<16x1xf32> to vector<16x32xf32>
    %9 = arith.subf %1, %8 : vector<16x32xf32>
    %10 = arith.mulf %9, %9 : vector<16x32xf32>
    %cst_6 = arith.constant dense<0.000000e+00> : vector<16xf32>
    %11 = vector.multi_reduction <add>, %10, %cst_6 [1] : vector<16x32xf32> to vector<16xf32>
    %12 = vector.shape_cast %11 : vector<16xf32> to vector<16x1xf32>
    %cst_7 = arith.constant 3.200000e+01 : f32
    %13 = vector.broadcast %cst_7 : f32 to vector<16x1xf32>
    %14 = arith.divf %12, %13 : vector<16x1xf32>
    %cst_8 = arith.constant 9.99999974E-6 : f32
    %15 = vector.broadcast %cst_8 : f32 to vector<16x1xf32>
    %16 = arith.addf %14, %15 : vector<16x1xf32>
    %17 = math.rsqrt %16 : vector<16x1xf32>
    %18 = vector.broadcast %17 : vector<16x1xf32> to vector<16x32xf32>
    %19 = arith.mulf %9, %18 : vector<16x32xf32>
    %c0_9 = arith.constant 0 : index
    %c0_10 = arith.constant 0 : index
    %20 = vector.load %arg6[%c0_9, %c0_10] : memref<1x32xf32, #tpu.memory_space<vmem>>, vector<1x32xf32>
    %21 = vector.broadcast %20 : vector<1x32xf32> to vector<16x32xf32>
    %22 = arith.mulf %19, %21 : vector<16x32xf32>
    %c0_11 = arith.constant 0 : index
    %c0_12 = arith.constant 0 : index
    %23 = vector.load %arg3[%c0_11, %c0_12] : memref<32x64xf32, #tpu.memory_space<vmem>>, vector<32x64xf32>
    %cst_13 = arith.constant dense<0.000000e+00> : vector<16x64xf32>
    %24 = tpu.matmul %22, %23, %cst_13 {dimension_numbers = #tpu.dot_dimension_numbers<[1], [0], [0], [1], [0, 0, 1, 1], [], []>} : vector<16x32xf32>, vector<32x64xf32>, vector<16x64xf32> -> vector<16x64xf32>
    %c0_14 = arith.constant 0 : index
    %c0_15 = arith.constant 0 : index
    %25 = vector.load %arg4[%c0_14, %c0_15] : memref<32x128xf32, #tpu.memory_space<vmem>>, vector<32x128xf32>
    %cst_16 = arith.constant dense<0.000000e+00> : vector<8x128xf32>
    %26 = tpu.matmul %3, %25, %cst_16 {dimension_numbers = #tpu.dot_dimension_numbers<[1], [0], [0], [1], [0, 0, 1, 1], [], []>} : vector<8x32xf32>, vector<32x128xf32>, vector<8x128xf32> -> vector<8x128xf32>
    %27 = vector.shape_cast %26 : vector<8x128xf32> to vector<1x8x128xf32>
    %c0_17 = arith.constant 0 : index
    %c0_18 = arith.constant 0 : index
    %28 = vector.load %arg8[%c0_17, %c0_18] : memref<1x128xf32, #tpu.memory_space<vmem>>, vector<1x128xf32>
    %29 = vector.shape_cast %28 : vector<1x128xf32> to vector<1x1x128xf32>
    %30 = tpu.concatenate %29, %27 in 1 : vector<1x1x128xf32>, vector<1x8x128xf32> -> vector<1x9x128xf32>
    %31 = vector.shape_cast %24 : vector<16x64xf32> to vector<1x16x64xf32>
    %32 = vector.extract_strided_slice %31 {offsets = [0, 0, 0], sizes = [1, 16, 16], strides = [1, 1, 1]} : vector<1x16x64xf32> to vector<1x16x16xf32>
    %33 = vector.extract_strided_slice %30 {offsets = [0, 0, 0], sizes = [1, 9, 16], strides = [1, 1, 1]} : vector<1x9x128xf32> to vector<1x9x16xf32>
    %34 = vector.extract_strided_slice %30 {offsets = [0, 0, 64], sizes = [1, 9, 16], strides = [1, 1, 1]} : vector<1x9x128xf32> to vector<1x9x16xf32>
    "tpu.trace_start"() <{level = 10 : i32, message = "bnd,bmd->bnm"}> : () -> ()
    %cst_19 = arith.constant dense<0.000000e+00> : vector<1x16x9xf32>
    %35 = tpu.matmul %32, %33, %cst_19 {dimension_numbers = #tpu.dot_dimension_numbers<[2], [2], [1], [1], [0, 0, 0, 1, 1, 1], [0], [0]>} : vector<1x16x16xf32>, vector<1x9x16xf32>, vector<1x16x9xf32> -> vector<1x16x9xf32>
    "tpu.trace_stop"() : () -> ()
    %cst_20 = arith.constant dense<0xFF800000> : vector<1x16xf32>
    %36 = vector.multi_reduction <maximumf>, %35, %cst_20 [2] : vector<1x16x9xf32> to vector<1x16xf32>
    %37 = vector.shape_cast %36 : vector<1x16xf32> to vector<1x16x1xf32>
    %38 = vector.broadcast %37 : vector<1x16x1xf32> to vector<1x16x9xf32>
    %39 = arith.subf %35, %38 : vector<1x16x9xf32>
    %40 = math.exp %39 : vector<1x16x9xf32>
    %cst_21 = arith.constant dense<0.000000e+00> : vector<1x16xf32>
    %41 = vector.multi_reduction <add>, %40, %cst_21 [2] : vector<1x16x9xf32> to vector<1x16xf32>
    %42 = vector.shape_cast %41 : vector<1x16xf32> to vector<1x16x1xf32>
    %43 = tpu.reciprocal %42 : vector<1x16x1xf32> -> vector<1x16x1xf32>
    "tpu.trace_start"() <{level = 10 : i32, message = "bnm,bmd->bnd"}> : () -> ()
    %cst_22 = arith.constant dense<0.000000e+00> : vector<1x16x16xf32>
    %44 = tpu.matmul %40, %34, %cst_22 {dimension_numbers = #tpu.dot_dimension_numbers<[2], [1], [1], [2], [0, 0, 0, 1, 1, 2], [0], [0]>} : vector<1x16x9xf32>, vector<1x9x16xf32>, vector<1x16x16xf32> -> vector<1x16x16xf32>
    "tpu.trace_stop"() : () -> ()
    %45 = vector.broadcast %43 : vector<1x16x1xf32> to vector<1x16x16xf32>
    %46 = arith.mulf %44, %45 : vector<1x16x16xf32>
    %47 = vector.shape_cast %46 : vector<1x16x16xf32> to vector<16x16xf32>
    %48 = vector.extract_strided_slice %31 {offsets = [0, 0, 16], sizes = [1, 16, 16], strides = [1, 1, 1]} : vector<1x16x64xf32> to vector<1x16x16xf32>
    %49 = vector.extract_strided_slice %30 {offsets = [0, 0, 16], sizes = [1, 9, 16], strides = [1, 1, 1]} : vector<1x9x128xf32> to vector<1x9x16xf32>
    %50 = vector.extract_strided_slice %30 {offsets = [0, 0, 80], sizes = [1, 9, 16], strides = [1, 1, 1]} : vector<1x9x128xf32> to vector<1x9x16xf32>
    "tpu.trace_start"() <{level = 10 : i32, message = "bnd,bmd->bnm"}> : () -> ()
    %cst_23 = arith.constant dense<0.000000e+00> : vector<1x16x9xf32>
    %51 = tpu.matmul %48, %49, %cst_23 {dimension_numbers = #tpu.dot_dimension_numbers<[2], [2], [1], [1], [0, 0, 0, 1, 1, 1], [0], [0]>} : vector<1x16x16xf32>, vector<1x9x16xf32>, vector<1x16x9xf32> -> vector<1x16x9xf32>
    "tpu.trace_stop"() : () -> ()
    %cst_24 = arith.constant dense<0xFF800000> : vector<1x16xf32>
    %52 = vector.multi_reduction <maximumf>, %51, %cst_24 [2] : vector<1x16x9xf32> to vector<1x16xf32>
    %53 = vector.shape_cast %52 : vector<1x16xf32> to vector<1x16x1xf32>
    %54 = vector.broadcast %53 : vector<1x16x1xf32> to vector<1x16x9xf32>
    %55 = arith.subf %51, %54 : vector<1x16x9xf32>
    %56 = math.exp %55 : vector<1x16x9xf32>
    %cst_25 = arith.constant dense<0.000000e+00> : vector<1x16xf32>
    %57 = vector.multi_reduction <add>, %56, %cst_25 [2] : vector<1x16x9xf32> to vector<1x16xf32>
    %58 = vector.shape_cast %57 : vector<1x16xf32> to vector<1x16x1xf32>
    %59 = tpu.reciprocal %58 : vector<1x16x1xf32> -> vector<1x16x1xf32>
    "tpu.trace_start"() <{level = 10 : i32, message = "bnm,bmd->bnd"}> : () -> ()
    %cst_26 = arith.constant dense<0.000000e+00> : vector<1x16x16xf32>
    %60 = tpu.matmul %56, %50, %cst_26 {dimension_numbers = #tpu.dot_dimension_numbers<[2], [1], [1], [2], [0, 0, 0, 1, 1, 2], [0], [0]>} : vector<1x16x9xf32>, vector<1x9x16xf32>, vector<1x16x16xf32> -> vector<1x16x16xf32>
    "tpu.trace_stop"() : () -> ()
    %61 = vector.broadcast %59 : vector<1x16x1xf32> to vector<1x16x16xf32>
    %62 = arith.mulf %60, %61 : vector<1x16x16xf32>
    %63 = vector.shape_cast %62 : vector<1x16x16xf32> to vector<16x16xf32>
    %64 = vector.extract_strided_slice %31 {offsets = [0, 0, 32], sizes = [1, 16, 16], strides = [1, 1, 1]} : vector<1x16x64xf32> to vector<1x16x16xf32>
    %65 = vector.extract_strided_slice %30 {offsets = [0, 0, 32], sizes = [1, 9, 16], strides = [1, 1, 1]} : vector<1x9x128xf32> to vector<1x9x16xf32>
    %66 = vector.extract_strided_slice %30 {offsets = [0, 0, 96], sizes = [1, 9, 16], strides = [1, 1, 1]} : vector<1x9x128xf32> to vector<1x9x16xf32>
    "tpu.trace_start"() <{level = 10 : i32, message = "bnd,bmd->bnm"}> : () -> ()
    %cst_27 = arith.constant dense<0.000000e+00> : vector<1x16x9xf32>
    %67 = tpu.matmul %64, %65, %cst_27 {dimension_numbers = #tpu.dot_dimension_numbers<[2], [2], [1], [1], [0, 0, 0, 1, 1, 1], [0], [0]>} : vector<1x16x16xf32>, vector<1x9x16xf32>, vector<1x16x9xf32> -> vector<1x16x9xf32>
    "tpu.trace_stop"() : () -> ()
    %cst_28 = arith.constant dense<0xFF800000> : vector<1x16xf32>
    %68 = vector.multi_reduction <maximumf>, %67, %cst_28 [2] : vector<1x16x9xf32> to vector<1x16xf32>
    %69 = vector.shape_cast %68 : vector<1x16xf32> to vector<1x16x1xf32>
    %70 = vector.broadcast %69 : vector<1x16x1xf32> to vector<1x16x9xf32>
    %71 = arith.subf %67, %70 : vector<1x16x9xf32>
    %72 = math.exp %71 : vector<1x16x9xf32>
    %cst_29 = arith.constant dense<0.000000e+00> : vector<1x16xf32>
    %73 = vector.multi_reduction <add>, %72, %cst_29 [2] : vector<1x16x9xf32> to vector<1x16xf32>
    %74 = vector.shape_cast %73 : vector<1x16xf32> to vector<1x16x1xf32>
    %75 = tpu.reciprocal %74 : vector<1x16x1xf32> -> vector<1x16x1xf32>
    "tpu.trace_start"() <{level = 10 : i32, message = "bnm,bmd->bnd"}> : () -> ()
    %cst_30 = arith.constant dense<0.000000e+00> : vector<1x16x16xf32>
    %76 = tpu.matmul %72, %66, %cst_30 {dimension_numbers = #tpu.dot_dimension_numbers<[2], [1], [1], [2], [0, 0, 0, 1, 1, 2], [0], [0]>} : vector<1x16x9xf32>, vector<1x9x16xf32>, vector<1x16x16xf32> -> vector<1x16x16xf32>
    "tpu.trace_stop"() : () -> ()
    %77 = vector.broadcast %75 : vector<1x16x1xf32> to vector<1x16x16xf32>
    %78 = arith.mulf %76, %77 : vector<1x16x16xf32>
    %79 = vector.shape_cast %78 : vector<1x16x16xf32> to vector<16x16xf32>
    %80 = vector.extract_strided_slice %31 {offsets = [0, 0, 48], sizes = [1, 16, 16], strides = [1, 1, 1]} : vector<1x16x64xf32> to vector<1x16x16xf32>
    %81 = vector.extract_strided_slice %30 {offsets = [0, 0, 48], sizes = [1, 9, 16], strides = [1, 1, 1]} : vector<1x9x128xf32> to vector<1x9x16xf32>
    %82 = vector.extract_strided_slice %30 {offsets = [0, 0, 112], sizes = [1, 9, 16], strides = [1, 1, 1]} : vector<1x9x128xf32> to vector<1x9x16xf32>
    "tpu.trace_start"() <{level = 10 : i32, message = "bnd,bmd->bnm"}> : () -> ()
    %cst_31 = arith.constant dense<0.000000e+00> : vector<1x16x9xf32>
    %83 = tpu.matmul %80, %81, %cst_31 {dimension_numbers = #tpu.dot_dimension_numbers<[2], [2], [1], [1], [0, 0, 0, 1, 1, 1], [0], [0]>} : vector<1x16x16xf32>, vector<1x9x16xf32>, vector<1x16x9xf32> -> vector<1x16x9xf32>
    "tpu.trace_stop"() : () -> ()
    %cst_32 = arith.constant dense<0xFF800000> : vector<1x16xf32>
    %84 = vector.multi_reduction <maximumf>, %83, %cst_32 [2] : vector<1x16x9xf32> to vector<1x16xf32>
    %85 = vector.shape_cast %84 : vector<1x16xf32> to vector<1x16x1xf32>
    %86 = vector.broadcast %85 : vector<1x16x1xf32> to vector<1x16x9xf32>
    %87 = arith.subf %83, %86 : vector<1x16x9xf32>
    %88 = math.exp %87 : vector<1x16x9xf32>
    %cst_33 = arith.constant dense<0.000000e+00> : vector<1x16xf32>
    %89 = vector.multi_reduction <add>, %88, %cst_33 [2] : vector<1x16x9xf32> to vector<1x16xf32>
    %90 = vector.shape_cast %89 : vector<1x16xf32> to vector<1x16x1xf32>
    %91 = tpu.reciprocal %90 : vector<1x16x1xf32> -> vector<1x16x1xf32>
    "tpu.trace_start"() <{level = 10 : i32, message = "bnm,bmd->bnd"}> : () -> ()
    %cst_34 = arith.constant dense<0.000000e+00> : vector<1x16x16xf32>
    %92 = tpu.matmul %88, %82, %cst_34 {dimension_numbers = #tpu.dot_dimension_numbers<[2], [1], [1], [2], [0, 0, 0, 1, 1, 2], [0], [0]>} : vector<1x16x9xf32>, vector<1x9x16xf32>, vector<1x16x16xf32> -> vector<1x16x16xf32>
    "tpu.trace_stop"() : () -> ()
    %93 = vector.broadcast %91 : vector<1x16x1xf32> to vector<1x16x16xf32>
    %94 = arith.mulf %92, %93 : vector<1x16x16xf32>
    %95 = vector.shape_cast %94 : vector<1x16x16xf32> to vector<16x16xf32>
    %96 = tpu.concatenate %47, %63, %79, %95 in 1 : vector<16x16xf32>, vector<16x16xf32>, vector<16x16xf32>, vector<16x16xf32> -> vector<16x64xf32>
    %c0_35 = arith.constant 0 : index
    %c0_36 = arith.constant 0 : index
    %97 = vector.load %arg5[%c0_35, %c0_36] : memref<64x32xf32, #tpu.memory_space<vmem>>, vector<64x32xf32>
    %cst_37 = arith.constant dense<0.000000e+00> : vector<16x32xf32>
    %98 = tpu.matmul %96, %97, %cst_37 {dimension_numbers = #tpu.dot_dimension_numbers<[1], [0], [0], [1], [0, 0, 1, 1], [], []>} : vector<16x64xf32>, vector<64x32xf32>, vector<16x32xf32> -> vector<16x32xf32>
    %cst_38 = arith.constant dense<0.000000e+00> : vector<16xf32>
    %99 = vector.multi_reduction <add>, %98, %cst_38 [1] : vector<16x32xf32> to vector<16xf32>
    %100 = vector.shape_cast %99 : vector<16xf32> to vector<16x1xf32>
    %cst_39 = arith.constant 3.200000e+01 : f32
    %101 = vector.broadcast %cst_39 : f32 to vector<16x1xf32>
    %102 = arith.divf %100, %101 : vector<16x1xf32>
    %103 = vector.broadcast %102 : vector<16x1xf32> to vector<16x32xf32>
    %104 = arith.subf %98, %103 : vector<16x32xf32>
    %105 = arith.mulf %104, %104 : vector<16x32xf32>
    %cst_40 = arith.constant dense<0.000000e+00> : vector<16xf32>
    %106 = vector.multi_reduction <add>, %105, %cst_40 [1] : vector<16x32xf32> to vector<16xf32>
    %107 = vector.shape_cast %106 : vector<16xf32> to vector<16x1xf32>
    %cst_41 = arith.constant 3.200000e+01 : f32
    %108 = vector.broadcast %cst_41 : f32 to vector<16x1xf32>
    %109 = arith.divf %107, %108 : vector<16x1xf32>
    %cst_42 = arith.constant 9.99999974E-6 : f32
    %110 = vector.broadcast %cst_42 : f32 to vector<16x1xf32>
    %111 = arith.addf %109, %110 : vector<16x1xf32>
    %112 = math.rsqrt %111 : vector<16x1xf32>
    %113 = vector.broadcast %112 : vector<16x1xf32> to vector<16x32xf32>
    %114 = arith.mulf %104, %113 : vector<16x32xf32>
    %c0_43 = arith.constant 0 : index
    %c0_44 = arith.constant 0 : index
    %115 = vector.load %arg7[%c0_43, %c0_44] : memref<1x32xf32, #tpu.memory_space<vmem>>, vector<1x32xf32>
    %116 = vector.broadcast %115 : vector<1x32xf32> to vector<16x32xf32>
    %117 = arith.mulf %114, %116 : vector<16x32xf32>
    %118 = vector.shape_cast %117 : vector<16x32xf32> to vector<1x16x32xf32>
    %c0_45 = arith.constant 0 : index
    %c0_46 = arith.constant 0 : index
    %c0_47 = arith.constant 0 : index
    %119 = vector.load %arg9[%c0_45, %c0_46, %c0_47] : memref<1x16x32xf32, #tpu.memory_space<vmem>>, vector<1x16x32xf32>
    tpu.vector_store %arg9[%c0_45, %c0_46, %c0_47], %118 {strides = array<i32>} : memref<1x16x32xf32, #tpu.memory_space<vmem>>, vector<1x16x32xf32>,
    return
  }
  func.func @transform_0(%arg0: i32) -> (i32, i32, i32) {
    %c0_i32 = arith.constant 0 : i32
    %c0_i32_0 = arith.constant 0 : i32
    %c0_i32_1 = arith.constant 0 : i32
    return %arg0, %c0_i32, %c0_i32_0 : i32, i32, i32
  }
  func.func @transform_1(%arg0: i32) -> (i32, i32, i32) {
    %c0_i32 = arith.constant 0 : i32
    %c0_i32_0 = arith.constant 0 : i32
    %c0_i32_1 = arith.constant 0 : i32
    return %arg0, %c0_i32, %c0_i32_0 : i32, i32, i32
  }
  func.func @transform_2(%arg0: i32) -> (i32, i32) {
    %c0_i32 = arith.constant 0 : i32
    %c0_i32_0 = arith.constant 0 : i32
    %c0_i32_1 = arith.constant 0 : i32
    return %c0_i32, %c0_i32_0 : i32, i32
  }
  func.func @transform_3(%arg0: i32) -> (i32, i32) {
    %c0_i32 = arith.constant 0 : i32
    %c0_i32_0 = arith.constant 0 : i32
    %c0_i32_1 = arith.constant 0 : i32
    return %c0_i32, %c0_i32_0 : i32, i32
  }
  func.func @transform_4(%arg0: i32) -> (i32, i32) {
    %c0_i32 = arith.constant 0 : i32
    %c0_i32_0 = arith.constant 0 : i32
    %c0_i32_1 = arith.constant 0 : i32
    return %c0_i32, %c0_i32_0 : i32, i32
  }
  func.func @transform_5(%arg0: i32) -> (i32, i32) {
    %c0_i32 = arith.constant 0 : i32
    %c0_i32_0 = arith.constant 0 : i32
    %c0_i32_1 = arith.constant 0 : i32
    return %c0_i32, %c0_i32_0 : i32, i32
  }
  func.func @transform_6(%arg0: i32) -> (i32, i32) {
    %c0_i32 = arith.constant 0 : i32
    %c0_i32_0 = arith.constant 0 : i32
    %c0_i32_1 = arith.constant 0 : i32
    return %c0_i32, %c0_i32_0 : i32, i32
  }
  func.func @transform_7(%arg0: i32) -> (i32, i32) {
    %c0_i32 = arith.constant 0 : i32
    %c0_i32_0 = arith.constant 0 : i32
    %c0_i32_1 = arith.constant 0 : i32
    return %c0_i32, %c0_i32_0 : i32, i32
  }
  func.func @transform_8(%arg0: i32) -> (i32, i32, i32) {
    %c0_i32 = arith.constant 0 : i32
    %c0_i32_0 = arith.constant 0 : i32
    %c0_i32_1 = arith.constant 0 : i32
    return %arg0, %c0_i32, %c0_i32_0 : i32, i32, i32
  }
}

</mosaic_0001>

<bundles_post_ra>
// kernel: tpu_custom_call.1
= control target key start
LH: loop header
LB: loop body
LE: loop exit
PB: predicated region body
PF: predicated region fallthrough
CT: control target
= control target key end

     0   :  { %13 = vsyncpa [#allocation3], 0  ;;  %s2551_s0 = inlined_call_operand.vmem [shape: f32[2,16,32], index: 0, kind: input, shape index: {}]   ;;  %s2552_s1 = inlined_call_operand.hbm [shape: f32[2,8,32], index: 1, kind: input, shape index: {}]   ;;  %s2553_s2 = inlined_call_operand.vmem [shape: f32[32,64], index: 2, kind: input, shape index: {}]   ;;  %s2554_s3 = inlined_call_operand.vmem [shape: f32[32,128], index: 3, kind: input, shape index: {}]   ;;  %s2555_s4 = inlined_call_operand.vmem [shape: f32[64,32], index: 4, kind: input, shape index: {}]   ;;  %s2556_s5 = inlined_call_operand.vmem [shape: f32[1,32], index: 5, kind: input, shape index: {}]   ;;  %s2557_s6 = inlined_call_operand.vmem [shape: f32[1,32], index: 6, kind: input, shape index: {}]   ;;  %s2558_s7 = inlined_call_operand.vmem [shape: f32[1,128], index: 7, kind: input, shape index: {}]   ;;  %s2559_s8 = inlined_call_operand.hbm [shape: f32[2,16,32], index: 8, kind: output, shape index: {}]  }
   0x1   :  { %15 = vsyncpa [#allocation3 + $0x1], 0 }
   0x2   :  { %16 = vsyncpa [#allocation4], 0 }
   0x3   :  { %18 = vsyncpa [#allocation4 + $0x1], 0  ;;  %s2179_s27 = smov 0   ;;  %s2181_s28 = smov 0  }
   0x4   :  { %s2183_s29 = smov 0   ;;  %s2185_s30 = smov 0  }
   0x5 LB: > { %s2200_s9 = sadd.s32 4294967295, %s2117_s30   ;;  %s1607_s10 = sadd.s32 4294967294, %s2117_s30   ;;  %s2117_s30 = sphi %s2185_s30, %s2578_s30   ;;  %s2113_s29 = sphi %s2183_s29, %s2577_s29   ;;  %s2109_s28 = sphi %s2181_s28, %s2576_s28   ;;  %s2105_s27 = sphi %s2179_s27, %s2575_s27  }
   0x6   : > { %s2204_s11 = sadd.s32 1, %s2117_s30   ;;  %s57_s12 = sadd.s32 1, %s2113_s29 }
   0x7   : > { %s54_s13 = ssub.s32 %s2117_s30, %s2204_s11  ;;  %p64_p0 = scmp.ne.s32.totalorder %s2113_s29, %s2109_s28 }
   0x8   : > { %p55_p1 = scmp.eq.s32.totalorder %s54_s13, 0  ;;  %p65_p2 = scmp.eq.s32.totalorder %s2117_s30, 0 }
   0x9   : > { %p70_p3 = scmp.ne.s32.totalorder %s2109_s28, %s2105_s27  ;;  %p71_p4 = scmp.eq.s32.totalorder %s2200_s9, 0 }
   0xa   : > { %s2216_s14 = scalar_select %p55_p1, %s2113_s29, %s57_s12  }
   0xb   : > { %p2218_p5 = por %p65_p2, %p64_p0  ;;  %p2222_p6 = por %p71_p4, %p70_p3 }
   0xc   : > { %p220_p7 = scmp.eq.s32.totalorder %s2200_s9, 1  ;;  %p226_p8 = scmp.eq.s32.totalorder %s1607_s10, 1 }
   0xd   : > { %p1899_p10 = scmp.lt.s32.totalorder %s2117_s30, 2  ;;  %s272_s19 = sand.u32 1, %s2113_s29  }
   0xe   : > { %p2229_p11 = por %p220_p7, %p64_p0  ;;  %p2233_p12 = por %p226_p8, %p70_p3 }
   0xf   : > { %s1611_s20 = sshll.u32 %s2117_s30, 7  ;;  %s1610_s21 = sshll.u32 %s272_s19, 3 }
  0x10   : > { %s2563_s17 = scalar_select %p2229_p11, 1, 0 }
  0x11   : > { %s2564_s18 = scalar_select %p2233_p12, 1, 0 }
  0x12   : > { %s2242_s24 = scalar_lea.hbm %s2552_s1, %s1611_s20  ;;  %s276_s25 = scalar_lea.vmem [#allocation2], %s1610_s21 }
  0x13   : > { %s283_s26 = sshll.u32 %s276_s25, 4  ;;  %p2246_p13 = pnand %p1899_p10, %p2218_p5  ;;  %s2250_s26 = int_to_ptr.vmem [resolvable:$true] %s283_s26 }
  0x14   : > { %s273_s12 = scalar_lea.sflag [#allocation3], %s272_s19  ;;  %s2021_s13 = scalar_lea.hbm %s2242_s24, 128 }
  0x15   : > { %p2022_p2 = scmp.ne.s32.totalorder %s2242_s24, %s2021_s13  ;;  %p2023_p3 = pneg %p2246_p13 }
  0x16   : > { %s2026_s21 = scalar_lea.hbm %s2552_s1, 256  ;;  %p2027_p5 = scmp.lt.u32.totalorder %s2242_s24, %s2552_s1 }
  0x17   : > { %p2024_p4 = pnand %p2023_p3, %p2022_p2  ;;  %p2028_p8 = scmp.lt.u32.totalorder %s2026_s21, %s2021_s13 }
  0x18   : > { %p2030_p9 = scmp.lt.u32.totalorder %s2021_s13, %s2242_s24 }
  0x19   : > { %p2025_p7 = pneg %p2024_p4  ;;  %p2029_p10 = por %p2028_p8, %p2027_p5 }
  0x1b   : > { %p2031_p0 = por %p2030_p9, %p2029_p10 }
  0x1d   : > { %p2032_p1 = pnand %p2031_p0, %p2025_p7 }
  0x1f   : > { %2035 = shalt.err (!%p2032_p1)
}
  0x20   : > { %s2036_s19 = scalar_lea.vmem %s2250_s26, 128  ;;  %s2119_s25 = smov [#allocation2]  }
  0x21   : > { %p2037_p2 = scmp.ne.s32.totalorder %s2250_s26, %s2036_s19  ;;  %s2041_s15 = sshll.u32 %s2119_s25, 4  ;;  %s2042_s15 = int_to_ptr.vmem [resolvable:$false] %s2041_s15 }
  0x22   : > { %s2043_s20 = scalar_lea.vmem %s2042_s15, 256  ;;  %p2044_p11 = scmp.lt.s32.totalorder %s2250_s26, %s2042_s15 }
  0x23   : > { %p2039_p4 = pnand %p2037_p2, %p2023_p3  ;;  %p2045_p5 = scmp.lt.s32.totalorder %s2043_s20, %s2036_s19 }
  0x25   : > { %p2040_p12 = pneg %p2039_p4  ;;  %p2046_p8 = por %p2045_p5, %p2044_p11 }
  0x27   : > { %p2047_p9 = pnand %p2046_p8, %p2040_p12 }
  0x29   : > { %2050 = shalt.err (!%p2047_p9)
}
  0x2a   : > { %1894 = dma.hbm_to_vmem [thread:$0]  (!%p2246_p13), %s2242_s24, 128, %s2250_s26, %s273_s12  }
  0x2b   : > { %p2566_p0 = scmp.lt.s32.totalorder %s2117_s30, 3  ;;  %p2567_p1 = scmp.ge.s32.totalorder %s2117_s30, 1 }
  0x2d   : > { %p289_p3 = pnand %p2567_p1, %p2566_p0 }
  0x2e   : > { %s2284_s13 = sand.u32 (!%p289_p3), 1, %s2109_s28  }
  0x2f   : > { %292 = sbr.rel (%p289_p3) target bundleno = 2999 (0xbb7), region = 52  ;;  %s1613_s21 = sshll.u32 (!%p289_p3), %s2284_s13, 3 }
  0x30   : > { %s295_s22 = scalar_lea.sflag (!%p289_p3), [#allocation3], %s2284_s13  ;;  %s2288_s23 = scalar_lea.vmem (!%p289_p3), [#allocation2], %s1613_s21 }
  0x36   : > { %2096 = dma.done.wait (%p2222_p6), %s295_s22, 128  }
  0x37   : > { %2098 = vsyncadd (%p2222_p6), %s295_s22, 4294967168  ;;  %p336_p11 = scmp.lt.s32.totalorder %s2200_s9, 1  ;;  %vm344_vm0 = vcmask 261120   ;;  %v381_v14 = vld [vmem:[%s2553_s2] sm:$0xff]  ;;  %v382_v15 = vld [vmem:[%s2553_s2 + $0x8] sm:$0xff]  ;;  %v2120_v20 = vmov 0.0|0.0  }
  0x38   : > { %v383_v16 = vld [vmem:[%s2553_s2 + $0x10] sm:$0xff]  ;;  %v1809_v17 = vpack.c.bf16 %v382_v15, %v381_v14  ;;  %v384_v18 = vld [vmem:[%s2553_s2 + $0x18] sm:$0xff]  ;;  %v1617_v28 = vld [vmem:[%s2556_s5] ss:$0 sm:$0xff]  ;;  %vm2121_vm1 = vmmov 0   ;;  %v2122_v40 = vmov 0.0  }
  0x39   : > { %s337_s24 = scalar_select %p336_p11, %s2200_s9, 1  ;;  %v1813_v19 = vpack.c.bf16 %v384_v18, %v383_v16  ;;  %v466_v31 = vld [vmem:[%s2554_s3] sm:$0xff]  ;;  %v467_v32 = vld [vmem:[%s2554_s3 + $0x8] sm:$0xff]  ;;  %v468_v37 = vld [vmem:[%s2554_s3 + $0x10] sm:$0xff]  ;;  %vm549_vm2 = vcmask 130048   ;;  %vm547_vm3 = vcmask 1040384  }
  0x3a   : > { %1810 = vmatprep.subr.bf16.mxu1 %v1809_v17  ;;  %v1818_v35 = vpack.c.bf16 %v467_v32, %v466_v31  ;;  %v469_v38 = vld [vmem:[%s2554_s3 + $0x18] sm:$0xff]  ;;  %v343_v41 = vld [vmem:[%s2288_s23] sm:$0xff]  ;;  %vm2346_vm4 = vmpackc.low %vm549_vm2, %vm549_vm2  ;;  %vm636_vm5 = vcmask 72704   ;;  %s2123_s23 = smov 112   ;;  %s2124_s12 = smov 64   ;;  %vm2125_vm6 = vmmov 1  }
  0x3b   : > { %s1657_s26 = sshll.u32 %s337_s24, 4  ;;  %1812 = vmatpush3.bf16.msra.mxu1 %v1809_v17  ;;  %v1821_v39 = vpack.c.bf16 %v469_v38, %v468_v37  ;;  %v543_v45 = vld [vmem:[%s2558_s7] sm:$0x1]  ;;  %vm2365_vm7 = vmpackc.low %vm547_vm3, %vm2125_vm6  ;;  %s2127_s16 = smov 48   ;;  %vm1378_vm8 = vcmask 392192   ;;  %vm1389_vm9 = vcmask 523264  }
  0x3c   : > { %s340_s19 = scalar_lea.vmem %s2551_s0, %s1657_s26  ;;  %1814 = vmatprep.subr.bf16.mxu1 %v1813_v19  ;;  %s2128_s25 = smov 80  }
  0x3d   : > { %v341_v0 = vld [vmem:[%s340_s19] sm:$0xff]  ;;  %v342_v1 = vld [vmem:[%s340_s19 + $0x8] sm:$0xff]  ;;  %s2126_s19 = smov 96   ;;  %s2129_s15 = smov 32  }
  0x3e   : > { %v345_v2 = vsel %vm344_vm0, %v341_v0, 0.0  ;;  %v348_v3 = vsel %vm344_vm0, %v342_v1, 0.0  ;;  %s2130_s20 = smov 16   ;;  %p2572_p12 = scmp.ne.s32.totalorder %s2563_s17, 0 }
  0x3f   : > { %346 = vadd.xlane.f32.xlu0 %v345_v2  ;;  %1816 = vmatpush3.bf16.msra.mxu1 %v1813_v19  ;;  %s2131_s26 = smov [#allocation5]  }
  0x40   : > { %1817 = vmatprep.subr.bf16.mxu1 %v2120_v20  ;;  %s2055_s10 = sshll.u32 %s2131_s26, 4  ;;  %s2056_s10 = int_to_ptr.vmem [resolvable:$false] %s2055_s10 }
  0x43   : > { %349 = vadd.xlane.f32.xlu0 %v348_v3 }
  0xcc   : > { %v347_v4 = vpop.xlane.xlu0 %346 }
  0xcd   : > { %v352_v5 = vmul.f32 0.03125, %v347_v4 }
  0xcf   : > { %v354_v6 = vsub.f32 %v341_v0, %v352_v5 }
  0xd0   : > { %v350_v7 = vpop.xlane.xlu0 %349 }
  0xd1   : > { %v353_v8 = vmul.f32 0.03125, %v350_v7  ;;  %v356_v9 = vmul.f32 %v354_v6, %v354_v6 }
  0xd3   : > { %v355_v10 = vsub.f32 %v342_v1, %v353_v8  ;;  %v358_v11 = vsel %vm344_vm0, %v356_v9, 0.0 }
  0xd4   : > { %359 = vadd.xlane.f32.xlu1 %v358_v11 }
  0xd5   : > { %v357_v12 = vmul.f32 %v355_v10, %v355_v10 }
  0xd7   : > { %v361_v13 = vsel %vm344_vm0, %v357_v12, 0.0 }
  0xd8   : > { %362 = vadd.xlane.f32.xlu1 %v361_v13 }
 0x161   : > { %v360_v21 = vpop.xlane.xlu1 %359 }
 0x162   : > { %v364_v22 = vmul.f32 0.03125, %v360_v21 }
 0x164   : > { %v366_v23 = vadd.f32 1e-05, %v364_v22 }
 0x165   : > { %v363_v24 = vpop.xlane.xlu1 %362 }
 0x166   : > { %1981 = vrsqrt.f32 %v366_v23  ;;  %v365_v25 = vmul.f32 0.03125, %v363_v24 }
 0x168   : > { %v367_v26 = vadd.f32 1e-05, %v365_v25 }
 0x16a   : > { %1983 = vrsqrt.f32 %v367_v26 }
 0x170   : > { %v1982_v27 = vpop.eup %1981 }
 0x171   : > { %v370_v29 = vmul.f32 %v1982_v27, %v354_v6 }
 0x173   : > { %v379_v30 = vmul.f32 %v1617_v28, %v370_v29 }
 0x174   : > { %v1984_v33 = vpop.eup %1983 }
 0x175   : > { %v371_v34 = vmul.f32 %v1984_v33, %v355_v10  ;;  %1720 = vmatprep.mubr.msk.f32.mxu1 %vm344_vm0, %v379_v30 }
 0x177   : > { %v380_v36 = vmul.f32 %v1617_v28, %v371_v34 }
 0x179   : > { %1721 = vmatmul.mubr.msk.f32.vlgmr.msra.gmra.mrb[0].mxu1 %vm344_vm0, %v380_v36 }
 0x17a   : > { %1819 = vmatpush3.bf16.msra.mxu1 %v1818_v35  ;;  %1731 = vmatprep.mubr.msk.f32.mxu1 %vm2121_vm1, %v2122_v40 }
 0x17b   : > { %1820 = vmatprep.subr.bf16.mxu1 %v2120_v20 }
 0x17e   : > { %1822 = vmatpush3.bf16.msra.mxu1 %v1821_v39 }
 0x181   : > { %1732 = vmatmul.mubr.msk.f32.vlgmr.msra.gmra.mrb[2].mxu1 %vm344_vm0, %v343_v41 }
 0x24c   : > { %v2334_v42 = vpop.f32.mrb[0].mxu1 }
 0x24d   : > { %v2336_v43 = vpop.f32.mrb[1].mxu1 }
 0x24e   : > { %1738 = vmatprep.mubr.msk.f32.mxu0 %vm549_vm2, %v2336_v43 }
 0x254   : > { %v539_v44 = vpop.f32.mrb[2].mxu1 }
 0x255   : > { %v545_v46 = vrot.slane %v539_v44, 7  ;;  %v1733_v47 = vpop.f32.mrb[3].mxu1 }
 0x257   : > { %v548_v48 = vsel %vm547_vm3, %v543_v45, %v545_v46 }
 0x258   : > { %v1823_v50 = vpack.c.bf16 %v545_v46, %v548_v48  ;;  %v2350_v51 = vpack.i.bf16 %v545_v46, %v548_v48 }
 0x25a   : > { %1825 = vmatprep.subr.msk.bf16.mxu0 %vm2346_vm4, %v1823_v50 }
 0x25b   : > { %1828 = vmatpush3.bf16.xpose.msk.msra.mxu0 %vm2346_vm4, %v1823_v50 }
 0x262   : > { %1739 = vmatmul.mubr.msk.f32.vlgmr.msra.gmra.mrb[0].mxu0 %vm549_vm2, %v2334_v42 }
 0x335   : > { %v1740_v52 = vpop.f32.mrb[0].mxu0 }
 0x336   : > { %v627_v53 = vpop.f32.mrb[1].mxu0  ;;  %v640_v54 = vsel %vm636_vm5, %v1740_v52, -inf }
 0x337   : > { %641 = vmax.xlane.f32.xlu1 %v640_v54  ;;  %v637_v55 = vsel %vm636_vm5, %v627_v53, -inf }
 0x338   : > { %638 = vmax.xlane.f32.xlu0 %v637_v55 }
 0x348   : > { %1952 = vrot.lane.b32.xlu1 %v2350_v51, %s2123_s23 }
 0x34c   : > { %747 = vrot.lane.b32.xlu1 %v2336_v43, %s2123_s23 }
 0x34e   : > { %1947 = vrot.lane.b32.xlu0 %v2350_v51, %s2124_s12 }
 0x350   : > { %749 = vrot.lane.b32.xlu1 %v2334_v42, %s2123_s23 }
 0x3c4   : > { %v642_v56 = vpop.xlane.xlu1 %641 }
 0x3c5   : > { %v644_v57 = vsub.f32 %v1740_v52, %v642_v56  ;;  %v639_v58 = vpop.xlane.xlu0 %638 }
 0x3c6   : > { %v643_v59 = vsub.f32 %v627_v53, %v639_v58 }
 0x3c7   : > { %v647_v60 = vmul.f32 1.442695, %v644_v57 }
 0x3c8   : > { %v645_v61 = vmul.f32 1.442695, %v643_v59  ;;  %v1953_v62 = vpop.permute.xlu1 %1952 }
 0x3c9   : > { %v1955_v63 = vunpack.i.h.bf16 %v1953_v62  ;;  %v1948_v0 = vpop.permute.xlu0 %1947  ;;  %v1954_v1 = vunpack.i.l.bf16 %v1953_v62 }
 0x3ca   : > { %1985 = vpow2.f32 %v645_v61  ;;  %v1950_v2 = vunpack.i.h.bf16 %v1948_v0  ;;  %v1949_v3 = vunpack.i.l.bf16 %v1948_v0 }
 0x3cb   : > { %1987 = vpow2.f32 %v647_v60  ;;  %v1835_v6 = vpack.c.bf16 %v1955_v63, %v1954_v1 }
 0x3cc   : > { %v1829_v5 = vpack.c.bf16 %v1950_v2, %v1949_v3  ;;  %v748_v9 = vpop.permute.xlu1 %747 }
 0x3ce   : > { %1831 = vmatprep.subr.msk.bf16.mxu1 %vm2365_vm7, %v1829_v5 }
 0x3cf   : > { %1834 = vmatpush3.bf16.msk.msra.mxu1 %vm2365_vm7, %v1829_v5 }
 0x3d0   : > { %1837 = vmatprep.subr.msk.bf16.mxu1 %vm2346_vm4, %v1835_v6  ;;  %v750_v10 = vpop.permute.xlu1 %749 }
 0x3d4   : > { %v2375_v7 = vpop.eup %1985 }
 0x3d5   : > { %v2377_v8 = vpop.eup %1987  ;;  %1745 = vmatprep.mubr.msk.f32.mxu1 %vm636_vm5, %v2375_v7 }
 0x3d6   : > { %1746 = vmatmul.mubr.msk.f32.vlgmr.msra.gmra.mrb[4].mxu1 %vm636_vm5, %v2377_v8  ;;  %v652_v4 = vsel %vm636_vm5, %v2377_v8, 0.0 }
 0x3d7   : > { %1752 = vmatprep.mubr.msk.f32.mxu1 %vm549_vm2, %v748_v9 }
 0x3d8   : > { %1840 = vmatpush3.bf16.xpose.msk.msra.mxu1 %vm2346_vm4, %v1835_v6 }
 0x3df   : > { %1753 = vmatmul.mubr.msk.f32.vlgmr.msra.gmra.mrb[6].mxu1 %vm549_vm2, %v750_v10 }
 0x4a9   : > { %v2387_v11 = vpop.f32.mrb[4].mxu1 }
 0x4aa   : > { %v2389_v12 = vpop.f32.mrb[5].mxu1 }
 0x4b2   : > { %v1754_v13 = vpop.f32.mrb[6].mxu1 }
 0x4b3   : > { %v829_v14 = vpop.f32.mrb[7].mxu1  ;;  %v841_v15 = vsel %vm636_vm5, %v1754_v13, -inf }
 0x4b4   : > { %842 = vmax.xlane.f32.xlu1 %v841_v15  ;;  %v838_v16 = vsel %vm636_vm5, %v829_v14, -inf }
 0x4b5   : > { %839 = vmax.xlane.f32.xlu0 %v838_v16 }
 0x4c5   : > { %1962 = vrot.lane.b32.xlu1 %v2350_v51, %s2126_s19 }
 0x4c9   : > { %950 = vrot.lane.b32.xlu1 %v2334_v42, %s2126_s19 }
 0x4cb   : > { %1957 = vrot.lane.b32.xlu0 %v2350_v51, %s2127_s16 }
 0x4cf   : > { %948 = vrot.lane.b32.xlu0 %v2336_v43, %s2126_s19  ;;  %s1658_s19 = sshll.u32 %s2200_s9, 8  ;;  %s1509_s9 = scalar_lea.sflag [#allocation4], %s2284_s13 }
 0x4d0   : > { %s2503_s22 = scalar_lea.hbm %s2559_s8, %s1658_s19 }
 0x541   : > { %v843_v17 = vpop.xlane.xlu1 %842 }
 0x542   : > { %v845_v18 = vsub.f32 %v1754_v13, %v843_v17  ;;  %v840_v19 = vpop.xlane.xlu0 %839 }
 0x543   : > { %v844_v20 = vsub.f32 %v829_v14, %v840_v19 }
 0x544   : > { %v848_v21 = vmul.f32 1.442695, %v845_v18 }
 0x545   : > { %v846_v22 = vmul.f32 1.442695, %v844_v20  ;;  %v1963_v23 = vpop.permute.xlu1 %1962 }
 0x546   : > { %v1965_v24 = vunpack.i.h.bf16 %v1963_v23  ;;  %v1958_v25 = vpop.permute.xlu0 %1957  ;;  %v1964_v26 = vunpack.i.l.bf16 %v1963_v23 }
 0x547   : > { %1989 = vpow2.f32 %v846_v22  ;;  %v1960_v27 = vunpack.i.h.bf16 %v1958_v25  ;;  %v1959_v28 = vunpack.i.l.bf16 %v1958_v25 }
 0x548   : > { %1991 = vpow2.f32 %v848_v21  ;;  %v1847_v30 = vpack.c.bf16 %v1965_v24, %v1964_v26  ;;  %v649_v26 = vsel %vm636_vm5, %v2375_v7, 0.0 }
 0x549   : > { %v1841_v29 = vpack.c.bf16 %v1960_v27, %v1959_v28  ;;  %v951_v34 = vpop.permute.xlu1 %950 }
 0x54a   : > { %v949_v33 = vpop.permute.xlu0 %948 }
 0x54b   : > { %1843 = vmatprep.subr.msk.bf16.mxu0 %vm2365_vm7, %v1841_v29 }
 0x54c   : > { %1846 = vmatpush3.bf16.msk.msra.mxu0 %vm2365_vm7, %v1841_v29 }
 0x54d   : > { %1849 = vmatprep.subr.msk.bf16.mxu0 %vm2346_vm4, %v1847_v30 }
 0x551   : > { %v1990_v31 = vpop.eup %1989 }
 0x552   : > { %v1992_v32 = vpop.eup %1991  ;;  %1759 = vmatprep.mubr.msk.f32.mxu0 %vm636_vm5, %v1990_v31  ;;  %v850_v3 = vsel %vm636_vm5, %v1990_v31, 0.0 }
 0x553   : > { %1760 = vmatmul.mubr.msk.f32.vlgmr.msra.gmra.mrb[2].mxu0 %vm636_vm5, %v1992_v32  ;;  %v853_v5 = vsel %vm636_vm5, %v1992_v32, 0.0 }
 0x554   : > { %1766 = vmatprep.mubr.msk.f32.mxu0 %vm549_vm2, %v949_v33 }
 0x555   : > { %1852 = vmatpush3.bf16.xpose.msk.msra.mxu0 %vm2346_vm4, %v1847_v30 }
 0x55c   : > { %1767 = vmatmul.mubr.msk.f32.vlgmr.msra.gmra.mrb[4].mxu0 %vm549_vm2, %v951_v34 }
 0x626   : > { %v2410_v35 = vpop.f32.mrb[2].mxu0 }
 0x627   : > { %v2412_v36 = vpop.f32.mrb[3].mxu0 }
 0x62f   : > { %v1768_v37 = vpop.f32.mrb[4].mxu0 }
 0x630   : > { %v1030_v38 = vpop.f32.mrb[5].mxu0  ;;  %v1042_v39 = vsel %vm636_vm5, %v1768_v37, -inf }
 0x631   : > { %1043 = vmax.xlane.f32.xlu1 %v1042_v39  ;;  %v1039_v40 = vsel %vm636_vm5, %v1030_v38, -inf  ;;  %v1384_v39 = vld [vmem:[%s2555_s4 + $0x18] sm:$0xff] }
 0x632   : > { %1040 = vmax.xlane.f32.xlu0 %v1039_v40 }
 0x642   : > { %1972 = vrot.lane.b32.xlu1 %v2350_v51, %s2128_s25 }
 0x646   : > { %1151 = vrot.lane.b32.xlu1 %v2334_v42, %s2128_s25 }
 0x648   : > { %1967 = vrot.lane.b32.xlu0 %v2350_v51, %s2129_s15 }
 0x64c   : > { %1149 = vrot.lane.b32.xlu0 %v2336_v43, %s2128_s25 }
 0x6be   : > { %v1044_v41 = vpop.xlane.xlu1 %1043 }
 0x6bf   : > { %v1046_v44 = vsub.f32 %v1768_v37, %v1044_v41  ;;  %v1041_v45 = vpop.xlane.xlu0 %1040  ;;  %v1381_v37 = vld [vmem:[%s2555_s4] sm:$0xff] }
 0x6c0   : > { %v1045_v46 = vsub.f32 %v1030_v38, %v1041_v45  ;;  %v1385_v41 = vld [vmem:[%s2555_s4 + $0x20] sm:$0xff] }
 0x6c1   : > { %v1049_v47 = vmul.f32 1.442695, %v1046_v44  ;;  %v1386_v44 = vld [vmem:[%s2555_s4 + $0x28] sm:$0xff] }
 0x6c2   : > { %v1047_v48 = vmul.f32 1.442695, %v1045_v46  ;;  %v1973_v50 = vpop.permute.xlu1 %1972  ;;  %v1879_v45 = vpack.c.bf16 %v1386_v44, %v1385_v41 }
 0x6c3   : > { %v1975_v52 = vunpack.i.h.bf16 %v1973_v50  ;;  %v1968_v53 = vpop.permute.xlu0 %1967  ;;  %v1974_v54 = vunpack.i.l.bf16 %v1973_v50 }
 0x6c4   : > { %1993 = vpow2.f32 %v1047_v48  ;;  %v1970_v55 = vunpack.i.h.bf16 %v1968_v53  ;;  %v1969_v56 = vunpack.i.l.bf16 %v1968_v53  ;;  %v1388_v48 = vld [vmem:[%s2555_s4 + $0x38] sm:$0xff] }
 0x6c5   : > { %1995 = vpow2.f32 %v1049_v47  ;;  %v1859_v57 = vpack.c.bf16 %v1975_v52, %v1974_v54  ;;  %v1387_v47 = vld [vmem:[%s2555_s4 + $0x30] sm:$0xff] }
 0x6c6   : > { %v1853_v42 = vpack.c.bf16 %v1970_v55, %v1969_v56  ;;  %v1152_v60 = vpop.permute.xlu1 %1151  ;;  %v1883_v52 = vpack.c.bf16 %v1388_v48, %v1387_v47 }
 0x6c7   : > { %v1150_v59 = vpop.permute.xlu0 %1149 }
 0x6c8   : > { %1855 = vmatprep.subr.msk.bf16.mxu1 %vm2365_vm7, %v1853_v42 }
 0x6c9   : > { %1858 = vmatpush3.bf16.msk.msra.mxu1 %vm2365_vm7, %v1853_v42 }
 0x6ca   : > { %1861 = vmatprep.subr.msk.bf16.mxu1 %vm2346_vm4, %v1859_v57 }
 0x6ce   : > { %v1994_v43 = vpop.eup %1993 }
 0x6cf   : > { %v1996_v58 = vpop.eup %1995  ;;  %1773 = vmatprep.mubr.msk.f32.mxu1 %vm636_vm5, %v1994_v43  ;;  %v1051_v49 = vsel %vm636_vm5, %v1994_v43, 0.0 }
 0x6d0   : > { %1774 = vmatmul.mubr.msk.f32.vlgmr.msra.gmra.mrb[8].mxu1 %vm636_vm5, %v1996_v58  ;;  %v1054_v6 = vsel %vm636_vm5, %v1996_v58, 0.0 }
 0x6d1   : > { %1780 = vmatprep.mubr.msk.f32.mxu1 %vm549_vm2, %v1150_v59 }
 0x6d2   : > { %1864 = vmatpush3.bf16.xpose.msk.msra.mxu1 %vm2346_vm4, %v1859_v57 }
 0x6d9   : > { %1781 = vmatmul.mubr.msk.f32.vlgmr.msra.gmra.mrb[10].mxu1 %vm549_vm2, %v1152_v60 }
 0x7a3   : > { %v1775_v61 = vpop.f32.mrb[8].mxu1 }
 0x7a4   : > { %v1138_v62 = vpop.f32.mrb[9].mxu1 }
 0x7ac   : > { %v1782_v63 = vpop.f32.mrb[10].mxu1 }
 0x7ad   : > { %v1231_v0 = vpop.f32.mrb[11].mxu1  ;;  %v1243_v1 = vsel %vm636_vm5, %v1782_v63, -inf }
 0x7ae   : > { %1244 = vmax.xlane.f32.xlu1 %v1243_v1  ;;  %v1240_v2 = vsel %vm636_vm5, %v1231_v0, -inf }
 0x7af   : > { %1241 = vmax.xlane.f32.xlu0 %v1240_v2 }
 0x7b2   : > { %851 = vadd.xlane.f32.xlu1 %v850_v3 }
 0x7b6   : > { %854 = vadd.xlane.f32.xlu1 %v853_v5 }
 0x7ba   : > { %1052 = vadd.xlane.f32.xlu1 %v1051_v49 }
 0x7be   : > { %1055 = vadd.xlane.f32.xlu1 %v1054_v6 }
 0x7c5   : > { %1977 = vrot.lane.b32.xlu0 %v2350_v51, %s2130_s20 }
 0x83b   : > { %v1245_v9 = vpop.xlane.xlu1 %1244 }
 0x83c   : > { %v1247_v10 = vsub.f32 %v1782_v63, %v1245_v9  ;;  %v1242_v13 = vpop.xlane.xlu0 %1241 }
 0x83d   : > { %v1246_v14 = vsub.f32 %v1231_v0, %v1242_v13 }
 0x83e   : > { %v1250_v15 = vmul.f32 1.442695, %v1247_v10 }
 0x83f   : > { %v1248_v16 = vmul.f32 1.442695, %v1246_v14  ;;  %v852_v21 = vpop.xlane.xlu1 %851 }
 0x840   : > { %1997 = vpow2.f32 %v1250_v15  ;;  %v1978_v17 = vpop.permute.xlu0 %1977 }
 0x841   : > { %1999 = vpow2.f32 %v1248_v16  ;;  %v1980_v18 = vunpack.i.h.bf16 %v1978_v17  ;;  %v1979_v19 = vunpack.i.l.bf16 %v1978_v17 }
 0x843   : > { %v1865_v20 = vpack.c.bf16 %v1980_v18, %v1979_v19  ;;  %v855_v25 = vpop.xlane.xlu1 %854 }
 0x844   : > { %2001 = vrcp.f32 %v855_v25 }
 0x845   : > { %1867 = vmatprep.subr.msk.bf16.mxu0 %vm2365_vm7, %v1865_v20  ;;  %2003 = vrcp.f32 %v852_v21 }
 0x846   : > { %1870 = vmatpush3.bf16.msk.msra.mxu0 %vm2365_vm7, %v1865_v20 }
 0x847   : > { %v1053_v27 = vpop.xlane.xlu1 %1052 }
 0x848   : > { %2005 = vrcp.f32 %v1053_v27 }
 0x84a   : > { %v1998_v51 = vpop.eup %1997 }
 0x84b   : > { %v2000_v22 = vpop.eup %1999  ;;  %v1255_v23 = vsel %vm636_vm5, %v1998_v51, 0.0  ;;  %v1056_v28 = vpop.xlane.xlu1 %1055 }
 0x84c   : > { %1256 = vadd.xlane.f32.xlu1 %v1255_v23  ;;  %1787 = vmatprep.mubr.msk.f32.mxu0 %vm636_vm5, %v2000_v22  ;;  %v1252_v24 = vsel %vm636_vm5, %v2000_v22, 0.0  ;;  %2007 = vrcp.f32 %v1056_v28 }
 0x84d   : > { %1253 = vadd.xlane.f32.xlu0 %v1252_v24  ;;  %1788 = vmatmul.mubr.msk.f32.vlgmr.msra.gmra.mrb[6].mxu0 %vm636_vm5, %v1998_v51 }
 0x84e   : > { %v2002_v29 = vpop.eup %2001 }
 0x84f   : > { %v2004_v30 = vpop.eup %2003  ;;  %v947_v31 = vmul.f32 %v2002_v29, %v2410_v35  ;;  %v1382_v35 = vld [vmem:[%s2555_s4 + $0x8] sm:$0xff] }
 0x850   : > { %650 = vadd.xlane.f32.xlu1 %v649_v26  ;;  %v946_v32 = vmul.f32 %v2004_v30, %v2412_v36  ;;  %v1383_v36 = vld [vmem:[%s2555_s4 + $0x10] sm:$0xff]  ;;  %v1871_v38 = vpack.c.bf16 %v1382_v35, %v1381_v37 }
 0x851   : > { %v1875_v40 = vpack.c.bf16 %v1384_v39, %v1383_v36 }
 0x852   : > { %v2006_v7 = vpop.eup %2005  ;;  %1872 = vmatprep.subr.bf16.mxu0 %v1871_v38 }
 0x853   : > { %v1147_v33 = vmul.f32 %v2006_v7, %v1138_v62  ;;  %1874 = vmatpush3.bf16.msra.mxu0 %v1871_v38 }
 0x854   : > { %653 = vadd.xlane.f32.xlu1 %v652_v4  ;;  %1876 = vmatprep.subr.bf16.mxu0 %v1875_v40 }
 0x856   : > { %v2008_v8 = vpop.eup %2007 }
 0x857   : > { %v1148_v34 = vmul.f32 %v2008_v8, %v1775_v61  ;;  %1878 = vmatpush3.bf16.msra.mxu0 %v1875_v40 }
 0x858   : > { %1880 = vmatprep.subr.bf16.mxu0 %v1879_v45 }
 0x85b   : > { %1882 = vmatpush3.bf16.msra.mxu0 %v1879_v45 }
 0x85c   : > { %1884 = vmatprep.subr.bf16.mxu0 %v1883_v52 }
 0x85f   : > { %1886 = vmatpush3.bf16.msra.mxu0 %v1883_v52 }
 0x863   : > { %1354 = vrot.lane.b32.xlu0 %v947_v31, %s2130_s20 }
 0x865   : > { %1352 = vrot.lane.b32.xlu1 %v946_v32, %s2130_s20  ;;  %v1651_v32 = vld [vmem:[%s2557_s6] ss:$0 sm:$0xff] }
 0x869   : > { %1360 = vrot.lane.b32.xlu1 %v1147_v33, %s2129_s15 }
 0x86d   : > { %1362 = vrot.lane.b32.xlu1 %v1148_v34, %s2129_s15 }
 0x8d9   : > { %v1257_v50 = vpop.xlane.xlu1 %1256 }
 0x8da   : > { %v1254_v46 = vpop.xlane.xlu0 %1253 }
 0x8db   : > { %2009 = vrcp.f32 %v1254_v46 }
 0x8dc   : > { %2011 = vrcp.f32 %v1257_v50 }
 0x8dd   : > { %v651_v43 = vpop.xlane.xlu1 %650 }
 0x8de   : > { %2013 = vrcp.f32 %v651_v43  ;;  %v1355_v3 = vpop.permute.xlu0 %1354 }
 0x8e1   : > { %v654_v58 = vpop.xlane.xlu1 %653 }
 0x8e2   : > { %2015 = vrcp.f32 %v654_v58 }
 0x8e5   : > { %v2010_v54 = vpop.eup %2009  ;;  %v1353_v59 = vpop.permute.xlu1 %1352 }
 0x8e6   : > { %v2012_v42 = vpop.eup %2011 }
 0x8e8   : > { %v2014_v60 = vpop.eup %2013 }
 0x8e9   : > { %v1361_v61 = vpop.permute.xlu1 %1360  ;;  %v745_v62 = vmul.f32 %v2014_v60, %v2389_v12 }
 0x8eb   : > { %v1374_v1 = vsel %vm549_vm2, %v745_v62, %v1353_v59 }
 0x8ec   : > { %v2016_v63 = vpop.eup %2015  ;;  %v1376_v5 = vsel %vm344_vm0, %v1374_v1, %v1361_v61 }
 0x8ed   : > { %v1363_v0 = vpop.permute.xlu1 %1362  ;;  %v746_v2 = vmul.f32 %v2016_v63, %v2387_v11 }
 0x8ef   : > { %v1375_v6 = vsel %vm549_vm2, %v746_v2, %v1355_v3 }
 0x8f0   : > { %v1377_v10 = vsel %vm344_vm0, %v1375_v6, %v1363_v0 }
 0x920   : > { %v1789_v53 = vpop.f32.mrb[6].mxu0 }
 0x921   : > { %v1339_v55 = vpop.f32.mrb[7].mxu0  ;;  %v1349_v57 = vmul.f32 %v2012_v42, %v1789_v53 }
 0x922   : > { %v1348_v56 = vmul.f32 %v2010_v54, %v1339_v55 }
 0x924   : > { %1368 = vrot.lane.b32.xlu1 %v1348_v56, %s2127_s16 }
 0x928   : > { %1370 = vrot.lane.b32.xlu1 %v1349_v57, %s2127_s16  ;;  %s1614_s16 = sshll.u32 %s2284_s13, 4 }
 0x929   : > { %s335_s25 = scalar_lea.vmem [#allocation5], %s1614_s16  ;;  %s2057_s16 = scalar_lea.vmem %s2056_s10, 512 }
 0x92a   : > { %s1522_s15 = sshll.u32 %s335_s25, 4  ;;  %s2505_s15 = int_to_ptr.vmem [resolvable:$true] %s1522_s15 }
 0x92b   : > { %s2051_s24 = scalar_lea.vmem %s2505_s15, 256  ;;  %p2058_p10 = scmp.lt.s32.totalorder %s2505_s15, %s2056_s10 }
 0x92c   : > { %p2052_p6 = scmp.ne.s32.totalorder %s2505_s15, %s2051_s24  ;;  %p2059_p2 = scmp.lt.s32.totalorder %s2057_s16, %s2051_s24 }
 0x92e   : > { %p2053_p13 = pnand %p2052_p6, %p2572_p12  ;;  %p2060_p4 = por %p2059_p2, %p2058_p10 }
 0x930   : > { %p2054_p7 = pneg %p2053_p13 }
 0x932   : > { %p2061_p5 = pnand %p2060_p4, %p2054_p7 }
 0x996   : > { %v1369_v49 = vpop.permute.xlu1 %1368 }
 0x997   : > { %v1379_v9 = vsel %vm1378_vm8, %v1376_v5, %v1369_v49 }
 0x998   : > { %1806 = vmatprep.mubr.msk.f32.mxu0 %vm1389_vm9, %v1379_v9 }
 0x99a   : > { %v1371_v13 = vpop.permute.xlu1 %1370 }
 0x99b   : > { %v1380_v12 = vsel %vm1378_vm8, %v1377_v10, %v1371_v13 }
 0x99c   : > { %1807 = vmatmul.mubr.msk.f32.vlgmr.msra.gmra.mrb[8].mxu0 %vm1389_vm9, %v1380_v12 }
 0xa6f   : > { %v1808_v14 = vpop.f32.mrb[8].mxu0 }
 0xa70   : > { %v1462_v15 = vpop.f32.mrb[9].mxu0  ;;  %v1474_v16 = vsel %vm344_vm0, %v1808_v14, 0.0 }
 0xa71   : > { %1475 = vadd.xlane.f32.xlu0 %v1474_v16  ;;  %v1471_v11 = vsel %vm344_vm0, %v1462_v15, 0.0 }
 0xa72   : > { %1472 = vadd.xlane.f32.xlu1 %v1471_v11 }
 0xafe   : > { %v1476_v17 = vpop.xlane.xlu0 %1475 }
 0xaff   : > { %v1478_v18 = vmul.f32 0.03125, %v1476_v17  ;;  %v1473_v19 = vpop.xlane.xlu1 %1472 }
 0xb00   : > { %v1477_v20 = vmul.f32 0.03125, %v1473_v19 }
 0xb01   : > { %v1480_v21 = vsub.f32 %v1808_v14, %v1478_v18 }
 0xb02   : > { %v1479_v51 = vsub.f32 %v1462_v15, %v1477_v20 }
 0xb03   : > { %v1482_v22 = vmul.f32 %v1480_v21, %v1480_v21 }
 0xb04   : > { %v1481_v23 = vmul.f32 %v1479_v51, %v1479_v51 }
 0xb05   : > { %v1486_v24 = vsel %vm344_vm0, %v1482_v22, 0.0 }
 0xb06   : > { %1487 = vadd.xlane.f32.xlu0 %v1486_v24  ;;  %v1483_v25 = vsel %vm344_vm0, %v1481_v23, 0.0 }
 0xb07   : > { %1484 = vadd.xlane.f32.xlu1 %v1483_v25 }
 0xb93   : > { %v1488_v26 = vpop.xlane.xlu0 %1487 }
 0xb94   : > { %v1490_v4 = vmul.f32 0.03125, %v1488_v26  ;;  %v1485_v27 = vpop.xlane.xlu1 %1484 }
 0xb95   : > { %v1489_v28 = vmul.f32 0.03125, %v1485_v27 }
 0xb96   : > { %v1492_v29 = vadd.f32 1e-05, %v1490_v4 }
 0xb97   : > { %v1491_v30 = vadd.f32 1e-05, %v1489_v28 }
 0xb98   : > { %2017 = vrsqrt.f32 %v1492_v29 }
 0xb99   : > { %2019 = vrsqrt.f32 %v1491_v30 }
 0xba2   : > { %v2018_v31 = vpop.eup %2017 }
 0xba3   : > { %v2020_v7 = vpop.eup %2019  ;;  %v1496_v33 = vmul.f32 %v2018_v31, %v1480_v21 }
 0xba4   : > { %v1495_v8 = vmul.f32 %v2020_v7, %v1479_v51 }
 0xba5   : > { %v1505_v34 = vmul.f32 %v1651_v32, %v1496_v33 }
 0xba6   : > { %v1504_v37 = vmul.f32 %v1651_v32, %v1495_v8 }
 0xba7   : > { %1507 = vst.msk [vmem:[%s335_s25 + $0x8] sm:$0xff] %vm344_vm0, %v1505_v34 }
 0xba8   : > { %1506 = vst.msk [vmem:[%s335_s25] sm:$0xff] %vm344_vm0, %v1504_v37 }
 0xba9   : > { %2064 = shalt.err (!%p2061_p5)
}
 0xbaa   : > { %s2065_s23 = scalar_lea.hbm %s2503_s22, 256  ;;  %s2069_s25 = scalar_lea.hbm %s2559_s8, 512 }
 0xbab   : > { %p2066_p8 = scmp.ne.s32.totalorder %s2503_s22, %s2065_s23  ;;  %p2070_p1 = scmp.lt.u32.totalorder %s2503_s22, %s2559_s8 }
 0xbac   : > { %p2071_p3 = scmp.lt.u32.totalorder %s2069_s25, %s2065_s23  ;;  %p2073_p6 = scmp.lt.u32.totalorder %s2065_s23, %s2503_s22 }
 0xbad   : > { %p2067_p9 = pnand %p2066_p8, %p2572_p12 }
 0xbae   : > { %p2072_p11 = por %p2071_p3, %p2070_p1 }
 0xbaf   : > { %p2068_p0 = pneg %p2067_p9 }
 0xbb0   : > { %p2074_p13 = por %p2073_p6, %p2072_p11 }
 0xbb2   : > { %p2075_p7 = pnand %p2074_p13, %p2068_p0 }
 0xbb4   : > { %2078 = shalt.err (!%p2075_p7)
}
 0xbb5   : > { %s2132_s24 = smov 128   ;;  %s2133_s26 = smov 8  }
 0xbb6   : > { %1889 = dma.vmem_to_hbm [thread:$0]  (%p2572_p12), %s2505_s15, 256, %s2503_s22, %s1509_s9, %s2132_s24, %s2132_s24, %s2133_s26  }
 0xbb7 PF: > { %s1537_s10 = sand.u32 1, %s2105_s27   ;;  %p2573_p10 = scmp.ne.s32.totalorder %s2564_s18, 0 }
 0xbb8   : > { %p2574_p2 = scmp.ge.s32.totalorder %s2117_s30, 2  ;;  %s1538_s16 = scalar_lea.sflag [#allocation4], %s1537_s10 }
 0xbba   : > { %p1896_p4 = pnand %p2574_p2, %p2573_p10 }
 0xbbc   : > { %2100 = dma.done.wait (!%p1896_p4), %s1538_s16, 256  }
 0xbbd   : > { %2102 = vsyncadd (!%p1896_p4), %s1538_s16, 4294967040  ;;  %p21_p5 = scmp.ge.s32.totalorder %s2204_s11, 4   ;;  %s2575_s27 = smov %s2109_s28 }
 0xbbe   : > { %s2576_s28 = smov %s2113_s29  ;;  %s2577_s29 = smov %s2216_s14 }
 0xbbf   : > { %s2578_s30 = smov %s2204_s11  ;;  %23 = sbr.rel (!%p21_p5) target bundleno = 5 (0x5), region = 100 }
 0xbc6   :  { %1543 = vsyncpa [#allocation3], 1 }
 0xbc7   :  { %1545 = vsyncpa [#allocation3 + $0x1], 1 }
 0xbc8   :  { %1546 = vsyncpa [#allocation4], 1 }
 0xbc9   :  { %1548 = vsyncpa [#allocation4 + $0x1], 1 }

</bundles_post_ra>
